<compile_context>
chip_gen: v7x
topology: tpu7x:2x2x1
jax: 0.10.0
libtpu: 0.0.40
codegen_flags: <defaults>
</compile_context>

<pallas_src>
import functools

import jax
import jax.numpy as jnp
import numpy as np
from jax.experimental import pallas as pl
from jax.experimental.pallas import tpu as pltpu


def _conv1x1_kernel(x_ref, w_ref, b_ref, o_ref, *, num_channels):
    """1x1 conv over the channel axis on one pixel block.

    x_ref: (N, C, ...pixels) f32 VMEM block (rank 3 or 4)
    w_ref: (C,) f32 SMEM        -- one scalar weight per input channel
    b_ref: (1,) f32 SMEM        -- conv bias
    o_ref: (N, ...pixels) f32 VMEM block
    """
    x = x_ref[...]                              # whole (small) block, single vector load
    acc = x[:, 0] * w_ref[0] + b_ref[0]         # bias folded into the first FMA pass
    for c in range(1, num_channels):            # static unroll over C (= 3); stays on VPU
        acc = acc + x[:, c] * w_ref[c]
    o_ref[...] = acc


def _pick_row_tile(rows):
    # Largest 8-aligned sublane-row tile dividing the slab. Per-step input block is
    # N*C*rt*128*4 B (<< 1 MiB here), so double-buffering fits every generation's
    # scoped-VMEM default (16 MiB v5e / 32 MiB v6e, v7x) with huge margin.
    for cand in (32, 16, 8):
        if rows % cand == 0:
            return cand
    return rows


def conv1x1_pallas(x_flat, w, b):
    """x_flat: (N, C, P) f32 (contiguous NCHW pixels), w: (C,), b: (1,) -> (N, P) f32."""
    N, C, P = x_flat.shape
    kernel = functools.partial(_conv1x1_kernel, num_channels=C)
    smem = pl.BlockSpec(memory_space=pltpu.MemorySpace.SMEM)

    if P % 128 == 0:
        # Lane/sublane-dense path: pixels as a (rows, 128) slab, 1-D parallel grid.
        rows = P // 128
        rt = _pick_row_tile(rows)
        x4 = x_flat.reshape(N, C, rows, 128)    # contiguous reshape -> free
        y4 = pl.pallas_call(
            kernel,
            out_shape=jax.ShapeDtypeStruct((N, rows, 128), jnp.float32),
            grid=(rows // rt,),
            in_specs=[
                pl.BlockSpec((N, C, rt, 128), lambda i: (0, 0, i, 0)),
                smem,
                smem,
            ],
            out_specs=pl.BlockSpec((N, rt, 128), lambda i: (0, i, 0)),
            compiler_params=pltpu.CompilerParams(
                dimension_semantics=("parallel",)),
        )(x4, w, b)
        return y4.reshape(N, P)

    # Small / unaligned fallback: whole problem is a few KB -> one block, no grid.
    return pl.pallas_call(
        kernel,
        out_shape=jax.ShapeDtypeStruct((N, P), jnp.float32),
        in_specs=[pl.BlockSpec(memory_space=pltpu.MemorySpace.VMEM), smem, smem],
        out_specs=pl.BlockSpec(memory_space=pltpu.MemorySpace.VMEM),
    )(x_flat, w, b)


def _nearest_indices(in_size, out_size):
    # PyTorch 'nearest' (ONNX opset 11: asymmetric + floor): src = floor(dst * in / out).
    # Exact integer math -- no float-boundary rounding issues.
    return ((np.arange(out_size) * in_size) // out_size).astype(np.int32)


@functools.partial(jax.jit, static_argnames=("out_h", "out_w"))
def net_resize_forward(x, conv_w, conv_b, out_h=16, out_w=9):
    """x: (N, 3, H, W) f32 NCHW -> (N, 1, out_h, out_w) f32 NCHW."""
    N, C, H, W = x.shape
    x_flat = x.reshape(N, C, H * W).astype(jnp.float32)   # contiguous reshape, NO transpose
    w_vec = conv_w.reshape(C).astype(jnp.float32)         # Conv2d weight (1, 3, 1, 1) -> (3,)
    b_vec = conv_b.reshape(1).astype(jnp.float32)
    y = conv1x1_pallas(x_flat, w_vec, b_vec)               # (N, H*W)  -- conv first (exact commute)
    # Nearest-neighbor resize == one fused gather with static flat indices.
    h_idx = _nearest_indices(H, out_h)
    w_idx = _nearest_indices(W, out_w)
    flat_idx = (h_idx[:, None] * W + w_idx[None, :]).reshape(-1)   # (out_h*out_w,) int32
    out = jnp.take(y, jnp.asarray(flat_idx), axis=1)
    return out.reshape(N, 1, out_h, out_w)


if __name__ == "__main__":
    key = jax.random.PRNGKey(0)
    k_x, k_w, k_b, k_x2 = jax.random.split(key, 4)

    # Deterministic synthetic parameters (shapes from Conv2d(3, 1, 1)).
    conv_w = jax.random.normal(k_w, (1, 3, 1, 1), dtype=jnp.float32) * 0.5
    conv_b = jax.random.normal(k_b, (1,), dtype=jnp.float32) * 0.1

    def reference(x, w, b, out_h=16, out_w=9):
        # Pure-JAX reference in the ORIGINAL op order (resize -> conv).
        _, _, H, W = x.shape
        hi = _nearest_indices(H, out_h)
        wi = _nearest_indices(W, out_w)
        rs = x[:, :, hi, :][:, :, :, wi]                              # (N, 3, 16, 9)
        yy = jnp.einsum("nchw,c->nhw", rs, w.reshape(3)) + b[0]
        return yy[:, None, :, :]

    # Case 1: small upsample input (H*W not a multiple of 128 -> whole-array path).
    x_small = jax.random.normal(k_x, (2, 3, 8, 6), dtype=jnp.float32)
    out_small = jax.block_until_ready(net_resize_forward(x_small, conv_w, conv_b))
    assert out_small.shape == (2, 1, 16, 9)
    np.testing.assert_allclose(np.asarray(out_small),
                               np.asarray(reference(x_small, conv_w, conv_b)),
                               rtol=1e-5, atol=1e-5)

    # Case 2: larger input (H*W multiple of 128 -> lane/sublane-dense gridded path).
    x_big = jax.random.normal(k_x2, (2, 3, 128, 128), dtype=jnp.float32)
    out_big = jax.block_until_ready(net_resize_forward(x_big, conv_w, conv_b))
    assert out_big.shape == (2, 1, 16, 9)
    np.testing.assert_allclose(np.asarray(out_big),
                               np.asarray(reference(x_big, conv_w, conv_b)),
                               rtol=1e-5, atol=1e-5)

    print("KERNEL_OK")
</pallas_src>

<mosaic_0001>
module attributes {stable_mosaic.version = 11 : i64} {
  func.func @_conv1x1_kernel(%arg0: memref<2x3x48xf32, #tpu.memory_space<vmem>>, %arg1: memref<3xf32, #tpu.memory_space<smem>>, %arg2: memref<1xf32, #tpu.memory_space<smem>>, %arg3: memref<2x48xf32, #tpu.memory_space<vmem>>) attributes {dimension_semantics = [], scalar_prefetch = 0 : i64, scratch_operands = 0 : i64, tpu.core_type = #tpu.core_type<tc>} {
    %c0 = arith.constant 0 : index
    %c0_0 = arith.constant 0 : index
    %c0_1 = arith.constant 0 : index
    %0 = vector.load %arg0[%c0, %c0_0, %c0_1] : memref<2x3x48xf32, #tpu.memory_space<vmem>>, vector<2x3x48xf32>
    %1 = vector.extract_strided_slice %0 {offsets = [0, 0, 0], sizes = [2, 1, 48], strides = [1, 1, 1]} : vector<2x3x48xf32> to vector<2x1x48xf32>
    %2 = vector.shape_cast %1 : vector<2x1x48xf32> to vector<2x48xf32>
    %c0_2 = arith.constant 0 : index
    %3 = memref.load %arg1[%c0_2] : memref<3xf32, #tpu.memory_space<smem>>
    %4 = vector.broadcast %3 : f32 to vector<2x48xf32>
    %5 = arith.mulf %2, %4 : vector<2x48xf32>
    %c0_3 = arith.constant 0 : index
    %6 = memref.load %arg2[%c0_3] : memref<1xf32, #tpu.memory_space<smem>>
    %7 = vector.broadcast %6 : f32 to vector<2x48xf32>
    %8 = arith.addf %5, %7 : vector<2x48xf32>
    %9 = vector.extract_strided_slice %0 {offsets = [0, 1, 0], sizes = [2, 1, 48], strides = [1, 1, 1]} : vector<2x3x48xf32> to vector<2x1x48xf32>
    %10 = vector.shape_cast %9 : vector<2x1x48xf32> to vector<2x48xf32>
    %c1 = arith.constant 1 : index
    %11 = memref.load %arg1[%c1] : memref<3xf32, #tpu.memory_space<smem>>
    %12 = vector.broadcast %11 : f32 to vector<2x48xf32>
    %13 = arith.mulf %10, %12 : vector<2x48xf32>
    %14 = arith.addf %8, %13 : vector<2x48xf32>
    %15 = vector.extract_strided_slice %0 {offsets = [0, 2, 0], sizes = [2, 1, 48], strides = [1, 1, 1]} : vector<2x3x48xf32> to vector<2x1x48xf32>
    %16 = vector.shape_cast %15 : vector<2x1x48xf32> to vector<2x48xf32>
    %c2 = arith.constant 2 : index
    %17 = memref.load %arg1[%c2] : memref<3xf32, #tpu.memory_space<smem>>
    %18 = vector.broadcast %17 : f32 to vector<2x48xf32>
    %19 = arith.mulf %16, %18 : vector<2x48xf32>
    %20 = arith.addf %14, %19 : vector<2x48xf32>
    %c0_4 = arith.constant 0 : index
    %c0_5 = arith.constant 0 : index
    %21 = vector.load %arg3[%c0_4, %c0_5] : memref<2x48xf32, #tpu.memory_space<vmem>>, vector<2x48xf32>
    tpu.vector_store %arg3[%c0_4, %c0_5], %20 {strides = array<i32>} : memref<2x48xf32, #tpu.memory_space<vmem>>, vector<2x48xf32>,
    return
  }
}

</mosaic_0001>

<bundles_post_ra>
// kernel: net_resize_forward.1
= control target key start
LH: loop header
LB: loop body
LE: loop exit
PB: predicated region body
PF: predicated region fallthrough
CT: control target
= control target key end

     0   :  { %9 = vsyncpa [#allocation4], 0  ;;  %s128_s0 = inlined_call_operand.vmem [shape: f32[2,3,48], index: 0, kind: input, shape index: {}]   ;;  %s129_s1 = inlined_call_operand.vmem [shape: f32[3], index: 1, kind: input, shape index: {}]   ;;  %s130_s2 = inlined_call_operand.<no memory space> [shape: f32[1], index: 2, kind: input, shape index: {}]   ;;  %s131_s3 = inlined_call_operand.vmem [shape: f32[2,48], index: 3, kind: output, shape index: {}]  }
   0x1   :  { %s18_s14 = sshll.u32 %s129_s1, 4  ;;  %s19_s14 = int_to_ptr.vmem [resolvable:$true] %s18_s14 }
   0x2   :  { %s78_s15 = scalar_lea.vmem %s19_s14, 16  ;;  %p83_p1 = scmp.lt.s32.totalorder %s19_s14, %s19_s14 }
   0x3   :  { %p79_p0 = scmp.ne.s32.totalorder %s19_s14, %s78_s15  ;;  %p84_p2 = scmp.lt.s32.totalorder %s78_s15, %s78_s15 }
   0x5   :  { %p85_p3 = por %p84_p2, %p83_p1 }
   0x7   :  { %p86_p4 = pnand %p85_p3, %p79_p0 }
   0x9   :  { %89 = shalt.err (!%p86_p4)
}
   0xa   :  { %s92_s16 = smov [#allocation3]  }
   0xb   :  { %21 = dma.vmem_to_smem %s19_s14, 16, %s92_s16, [#allocation4]  }
   0xc   :  { %90 = dma.done.wait [#allocation4], 16  }
   0xd   :  { %91 = vsyncadd [#allocation4], 4294967280 }
   0xe   :  { %27 = sfence }
   0xf   :  { %s30_s17 = sld [smem:[#allocation3]]  ;;  %s75_s18 = sld [smem:[#allocation3 + $0x1]]  ;;  %v28_v0 = vld [vmem:[%s128_s0] sm:$0x7]  ;;  %v29_v1 = vld [vmem:[%s128_s0 + $0x4] sm:$0x7]  ;;  %v35_v3 = vstv %s130_s2 }
  0x10   :  { %s76_s19 = sld [smem:[#allocation3 + $0x2]]  ;;  %vm65_vm0 = vcmask 1041409   ;;  %vm68_vm1 = vcmask 386048  }
  0x15   :  { %v31_v2 = vstv %s30_s17  ;;  %v39_v6 = vstv %s75_s18 }
  0x16   :  { %v32_v4 = vmul.f32 %v31_v2, %v28_v0  ;;  %v33_v5 = vmul.f32 %v31_v2, %v29_v1  ;;  %v51_v7 = vstv %s76_s19  ;;  %v40_v8 = vmul.f32 %v39_v6, %v28_v0 }
  0x17   :  { %v41_v9 = vmul.f32 %v39_v6, %v29_v1  ;;  %v52_v10 = vmul.f32 %v51_v7, %v28_v0  ;;  %v53_v11 = vmul.f32 %v51_v7, %v29_v1 }
  0x18   :  { %v36_v12 = vadd.f32 %v35_v3, %v32_v4  ;;  %v37_v13 = vadd.f32 %v35_v3, %v33_v5  ;;  %v44_v14 = vrot.slane %v40_v8, 1 }
  0x19   :  { %v45_v15 = vrot.slane %v41_v9, 1  ;;  %v56_v16 = vrot.slane %v52_v10, 2  ;;  %v57_v17 = vrot.slane %v53_v11, 2 }
  0x1a   :  { %v48_v18 = vadd.f32 %v44_v14, %v36_v12 }
  0x1b   :  { %v49_v19 = vadd.f32 %v45_v15, %v37_v13 }
  0x1c   :  { %v60_v20 = vadd.f32 %v56_v16, %v48_v18 }
  0x1d   :  { %v61_v21 = vadd.f32 %v57_v17, %v49_v19 }
  0x1f   :  { %v64_v22 = vrot.slane %v61_v21, 7 }
  0x21   :  { %v66_v23 = vsel %vm65_vm0, %v64_v22, %v60_v20 }
  0x22   :  { %69 = vst.msk [vmem:[%s131_s3] sm:$0x3] %vm68_vm1, %v66_v23 }
  0x23   :  { %74 = vsyncpa [#allocation4], 1 }

</bundles_post_ra>
